<compile_context>
chip_gen: v7x
topology: tpu7x:2x2x1
jax: 0.10.0
libtpu: 0.0.40
codegen_flags: <defaults>
</compile_context>

<pallas_src>
import functools

import jax
import jax.numpy as jnp
from jax.experimental import pallas as pl
from jax.experimental.pallas import tpu as pltpu


# ---------------------------------------------------------------------------
# in-kernel helpers
# ---------------------------------------------------------------------------
def _layernorm(x, gamma, beta, eps=1e-5):
    # x: (T, D) f32; gamma/beta: (1, D). Matches torch.nn.LayerNorm (biased var, eps=1e-5).
    mean = jnp.mean(x, axis=-1, keepdims=True)
    var = jnp.mean((x - mean) ** 2, axis=-1, keepdims=True)
    return (x - mean) * jax.lax.rsqrt(var + eps) * gamma + beta


# ---------------------------------------------------------------------------
# attention kernel
# grid = (B, N//tq, H, M//tk); output block (1, tq, D) resident across (H, KV)
# ---------------------------------------------------------------------------
def attn_kernel(x_ref, ctx_ref, g_ref, b_ref,
                wq_ref, wk_ref, wv_ref, wo_ref, bo_ref,
                o_ref,
                xn_s, q_s, m_s, l_s, acc_s, out_s,
                *, scale, self_attn):
    h = pl.program_id(2)
    ki = pl.program_id(3)
    nh = pl.num_programs(2)
    nk = pl.num_programs(3)

    # q-side LayerNorm + output accumulator reset: once per (b, q-tile)
    @pl.when(jnp.logical_and(h == 0, ki == 0))
    def _():
        x = x_ref[0].astype(jnp.float32)
        xn_s[...] = _layernorm(x, g_ref[...], b_ref[...]).astype(jnp.bfloat16)
        out_s[...] = jnp.zeros_like(out_s)

    # per-head q projection + flash-state reset: once per (q-tile, head)
    @pl.when(ki == 0)
    def _():
        q_s[...] = jnp.dot(xn_s[...], wq_ref[0],
                           preferred_element_type=jnp.float32).astype(jnp.bfloat16)
        m_s[...] = jnp.full_like(m_s, -jnp.inf)
        l_s[...] = jnp.zeros_like(l_s)
        acc_s[...] = jnp.zeros_like(acc_s)

    # k/v for this kv tile & head (bf16 operands, f32 accumulation)
    c = ctx_ref[0].astype(jnp.float32)
    if self_attn:
        c = _layernorm(c, g_ref[...], b_ref[...])   # self-attn: k/v from norm1(x)
    c = c.astype(jnp.bfloat16)
    k = jnp.dot(c, wk_ref[0], preferred_element_type=jnp.float32).astype(jnp.bfloat16)
    v = jnp.dot(c, wv_ref[0], preferred_element_type=jnp.float32).astype(jnp.bfloat16)

    # online softmax update
    s = jax.lax.dot_general(q_s[...], k, (((1,), (1,)), ((), ())),
                            preferred_element_type=jnp.float32) * scale      # (tq, tk) f32
    m_prev = m_s[...]
    m_new = jnp.maximum(m_prev, jnp.max(s, axis=-1, keepdims=True))
    alpha = jnp.exp(m_prev - m_new)
    p = jnp.exp(s - m_new)
    l_s[...] = alpha * l_s[...] + jnp.sum(p, axis=-1, keepdims=True)
    acc_s[...] = alpha * acc_s[...] + jnp.dot(p.astype(jnp.bfloat16), v,
                                              preferred_element_type=jnp.float32)
    m_s[...] = m_new

    # end of this head's KV sweep: per-head output projection, accumulate over heads
    @pl.when(ki == nk - 1)
    def _():
        o_h = acc_s[...] * pl.reciprocal(l_s[...], approx=True)              # (tq, dh) f32
        out_s[...] += jnp.dot(o_h.astype(jnp.bfloat16), wo_ref[0],
                              preferred_element_type=jnp.float32)

    # last head, last KV tile: bias + residual, write
    @pl.when(jnp.logical_and(h == nh - 1, ki == nk - 1))
    def _():
        o_ref[0] = (out_s[...] + bo_ref[...]
                    + x_ref[0].astype(jnp.float32)).astype(o_ref.dtype)


# ---------------------------------------------------------------------------
# GEGLU feed-forward kernel
# grid = (B, N//tq, F//tf); the (N, 8*dim) intermediate is never materialized
# ---------------------------------------------------------------------------
def ff_kernel(x_ref, g_ref, b_ref,
              w1v_ref, b1v_ref, w1g_ref, b1g_ref, w2_ref, b2_ref,
              o_ref,
              xn_s, y_s):
    fi = pl.program_id(2)
    nf = pl.num_programs(2)

    @pl.when(fi == 0)
    def _():
        x = x_ref[0].astype(jnp.float32)
        xn_s[...] = _layernorm(x, g_ref[...], b_ref[...]).astype(jnp.bfloat16)
        y_s[...] = jnp.zeros_like(y_s)

    xn = xn_s[...]
    a = jnp.dot(xn, w1v_ref[...], preferred_element_type=jnp.float32) + b1v_ref[...]
    g = jnp.dot(xn, w1g_ref[...], preferred_element_type=jnp.float32) + b1g_ref[...]
    hg = (a * jax.nn.gelu(g, approximate=False)).astype(jnp.bfloat16)   # exact-erf GELU
    y_s[...] += jnp.dot(hg, w2_ref[...], preferred_element_type=jnp.float32)

    @pl.when(fi == nf - 1)
    def _():
        o_ref[0] = (y_s[...] + b2_ref[...]
                    + x_ref[0].astype(jnp.float32)).astype(o_ref.dtype)


# ---------------------------------------------------------------------------
# wrappers
# ---------------------------------------------------------------------------
_VMEM_LIMIT = 48 * 1024 * 1024


def attn_block(x, ctx, gamma, beta, wq, wk, wv, wo, bo, *, scale, self_attn, tq, tk):
    B, N, D = x.shape
    _, M, Dc = ctx.shape
    H, _, dh = wq.shape
    assert N % tq == 0 and M % tk == 0, "tile sizes must divide sequence lengths"

    kern = functools.partial(attn_kernel, scale=scale, self_attn=self_attn)
    return pl.pallas_call(
        kern,
        out_shape=jax.ShapeDtypeStruct((B, N, D), x.dtype),
        grid_spec=pltpu.PrefetchScalarGridSpec(
            num_scalar_prefetch=0,
            grid=(B, N // tq, H, M // tk),
            in_specs=[
                pl.BlockSpec((1, tq, D), lambda b, qi, h, ki: (b, qi, 0)),   # x (q-side)
                pl.BlockSpec((1, tk, Dc), lambda b, qi, h, ki: (b, ki, 0)),  # context (kv-side)
                pl.BlockSpec((1, D), lambda b, qi, h, ki: (0, 0)),           # ln gamma
                pl.BlockSpec((1, D), lambda b, qi, h, ki: (0, 0)),           # ln beta
                pl.BlockSpec((1, D, dh), lambda b, qi, h, ki: (h, 0, 0)),    # wq[h]
                pl.BlockSpec((1, Dc, dh), lambda b, qi, h, ki: (h, 0, 0)),   # wk[h]
                pl.BlockSpec((1, Dc, dh), lambda b, qi, h, ki: (h, 0, 0)),   # wv[h]
                pl.BlockSpec((1, dh, D), lambda b, qi, h, ki: (h, 0, 0)),    # wo[h]
                pl.BlockSpec((1, D), lambda b, qi, h, ki: (0, 0)),           # bo
            ],
            out_specs=pl.BlockSpec((1, tq, D), lambda b, qi, h, ki: (b, qi, 0)),
            scratch_shapes=[
                pltpu.VMEM((tq, D), jnp.bfloat16),   # xn (normed q-side rows)
                pltpu.VMEM((tq, dh), jnp.bfloat16),  # q for current head
                pltpu.VMEM((tq, 1), jnp.float32),    # m (running max)
                pltpu.VMEM((tq, 1), jnp.float32),    # l (running denom)
                pltpu.VMEM((tq, dh), jnp.float32),   # acc (running numerator)
                pltpu.VMEM((tq, D), jnp.float32),    # output accumulator over heads
            ],
        ),
        compiler_params=pltpu.CompilerParams(
            dimension_semantics=("parallel", "parallel", "arbitrary", "arbitrary"),
            vmem_limit_bytes=_VMEM_LIMIT,
        ),
    )(x, ctx, gamma, beta, wq, wk, wv, wo, bo)


def ff_block(x, gamma, beta, w1v, b1v, w1g, b1g, w2, b2, *, tq, tf):
    B, N, D = x.shape
    F = w1v.shape[1]
    assert N % tq == 0 and F % tf == 0, "tile sizes must divide dims"

    return pl.pallas_call(
        ff_kernel,
        out_shape=jax.ShapeDtypeStruct((B, N, D), x.dtype),
        grid_spec=pltpu.PrefetchScalarGridSpec(
            num_scalar_prefetch=0,
            grid=(B, N // tq, F // tf),
            in_specs=[
                pl.BlockSpec((1, tq, D), lambda b, qi, fi: (b, qi, 0)),   # x
                pl.BlockSpec((1, D), lambda b, qi, fi: (0, 0)),           # ln gamma
                pl.BlockSpec((1, D), lambda b, qi, fi: (0, 0)),           # ln beta
                pl.BlockSpec((D, tf), lambda b, qi, fi: (0, fi)),         # w1 value half
                pl.BlockSpec((1, tf), lambda b, qi, fi: (0, fi)),         # b1 value half
                pl.BlockSpec((D, tf), lambda b, qi, fi: (0, fi)),         # w1 gate half
                pl.BlockSpec((1, tf), lambda b, qi, fi: (0, fi)),         # b1 gate half
                pl.BlockSpec((tf, D), lambda b, qi, fi: (fi, 0)),         # w2
                pl.BlockSpec((1, D), lambda b, qi, fi: (0, 0)),           # b2
            ],
            out_specs=pl.BlockSpec((1, tq, D), lambda b, qi, fi: (b, qi, 0)),
            scratch_shapes=[
                pltpu.VMEM((tq, D), jnp.bfloat16),   # xn
                pltpu.VMEM((tq, D), jnp.float32),    # y accumulator
            ],
        ),
        compiler_params=pltpu.CompilerParams(
            dimension_semantics=("parallel", "parallel", "arbitrary"),
            vmem_limit_bytes=_VMEM_LIMIT,
        ),
    )(x, gamma, beta, w1v, b1v, w1g, b1g, w2, b2)


def basic_transformer_block(x, context, params, *, n_heads, d_head,
                            tq=256, tk=256, tf=512):
    scale = float(d_head) ** -0.5
    N, M = x.shape[1], context.shape[1]
    F = params["ff_w1v"].shape[1]
    tq_ = min(tq, N)
    tk_self, tk_cross = min(tk, N), min(tk, M)
    tf_ = min(tf, F)

    # attn1: self-attention; q and k/v both from norm1(x) (layernorm applied in-kernel
    # per tile, so x is only streamed once per role and never pre-duplicated).
    x = attn_block(x, x, params["norm1_g"], params["norm1_b"],
                   params["attn1_wq"], params["attn1_wk"], params["attn1_wv"],
                   params["attn1_wo"], params["attn1_bo"],
                   scale=scale, self_attn=True, tq=tq_, tk=tk_self)
    # attn2: q from norm2(x), k/v from raw context
    x = attn_block(x, context, params["norm2_g"], params["norm2_b"],
                   params["attn2_wq"], params["attn2_wk"], params["attn2_wv"],
                   params["attn2_wo"], params["attn2_bo"],
                   scale=scale, self_attn=False, tq=tq_, tk=tk_cross)
    # GEGLU feed-forward over norm3(x)
    x = ff_block(x, params["norm3_g"], params["norm3_b"],
                 params["ff_w1v"], params["ff_b1v"], params["ff_w1g"], params["ff_b1g"],
                 params["ff_w2"], params["ff_b2"], tq=tq_, tf=tf_)
    return x


# ---------------------------------------------------------------------------
# deterministic parameter construction (synthetic init, no checkpoint)
# weights stored bf16 (MXU operands), norms/biases f32, per-head weight layout
# ---------------------------------------------------------------------------
def make_params(key, dim, n_heads, d_head, context_dim):
    F = dim * 4
    ks = jax.random.split(key, 11)
    f32, bf16 = jnp.float32, jnp.bfloat16

    def w(k, shape):
        return (0.02 * jax.random.normal(k, shape, dtype=f32)).astype(bf16)

    return {
        # LayerNorms (torch init: gamma=1, beta=0)
        "norm1_g": jnp.ones((1, dim), f32), "norm1_b": jnp.zeros((1, dim), f32),
        "norm2_g": jnp.ones((1, dim), f32), "norm2_b": jnp.zeros((1, dim), f32),
        "norm3_g": jnp.ones((1, dim), f32), "norm3_b": jnp.zeros((1, dim), f32),
        # attn1 (self): to_q/k/v bias-free, to_out with bias; per-head layout
        "attn1_wq": w(ks[0], (n_heads, dim, d_head)),
        "attn1_wk": w(ks[1], (n_heads, dim, d_head)),
        "attn1_wv": w(ks[2], (n_heads, dim, d_head)),
        "attn1_wo": w(ks[3], (n_heads, d_head, dim)),
        "attn1_bo": jnp.zeros((1, dim), f32),
        # attn2 (cross): k/v take context_dim
        "attn2_wq": w(ks[4], (n_heads, dim, d_head)),
        "attn2_wk": w(ks[5], (n_heads, context_dim, d_head)),
        "attn2_wv": w(ks[6], (n_heads, context_dim, d_head)),
        "attn2_wo": w(ks[7], (n_heads, d_head, dim)),
        "attn2_bo": jnp.zeros((1, dim), f32),
        # FeedForward with GEGLU: Linear(dim, 2*F) split into value/gate halves -> Linear(F, dim)
        "ff_w1v": w(ks[8], (dim, F)), "ff_b1v": jnp.zeros((1, F), f32),
        "ff_w1g": w(ks[9], (dim, F)), "ff_b1g": jnp.zeros((1, F), f32),
        "ff_w2": w(ks[10], (F, dim)), "ff_b2": jnp.zeros((1, dim), f32),
    }


if __name__ == "__main__":
    # small shapes consistent with the module (kept tiny, but chosen so every
    # grid axis — q tiles, kv tiles, heads, ff tiles — actually iterates)
    B, N, dim = 2, 16, 64
    n_heads, d_head = 4, 16          # inner_dim = 64
    M, context_dim = 16, 32          # cross-attention context
    tq, tk, tf = 8, 8, 128           # small test tiles (use ~256/256/512 for real shapes)

    key = jax.random.PRNGKey(0)
    kx, kc, kp = jax.random.split(key, 3)
    x = jax.random.normal(kx, (B, N, dim), dtype=jnp.float32)
    context = jax.random.normal(kc, (B, M, context_dim), dtype=jnp.float32)
    params = make_params(kp, dim, n_heads, d_head, context_dim)

    out = basic_transformer_block(x, context, params,
                                  n_heads=n_heads, d_head=d_head,
                                  tq=tq, tk=tk, tf=tf)
    out = jax.block_until_ready(out)
    assert out.shape == (B, N, dim) and out.dtype == jnp.float32
    assert bool(jnp.all(jnp.isfinite(out)))
    print("KERNEL_OK")
</pallas_src>

<mosaic_0001>
module attributes {stable_mosaic.version = 11 : i64} {
  func.func @attn_kernel(%arg0: i32, %arg1: i32, %arg2: i32, %arg3: i32, %arg4: memref<1x8x64xf32, #tpu.memory_space<vmem>>, %arg5: memref<1x8x64xf32, #tpu.memory_space<vmem>>, %arg6: memref<1x64xf32, #tpu.memory_space<vmem>>, %arg7: memref<1x64xf32, #tpu.memory_space<vmem>>, %arg8: memref<1x64x16xbf16, #tpu.memory_space<vmem>>, %arg9: memref<1x64x16xbf16, #tpu.memory_space<vmem>>, %arg10: memref<1x64x16xbf16, #tpu.memory_space<vmem>>, %arg11: memref<1x16x64xbf16, #tpu.memory_space<vmem>>, %arg12: memref<1x64xf32, #tpu.memory_space<vmem>>, %arg13: memref<1x8x64xf32, #tpu.memory_space<vmem>>, %arg14: memref<8x64xbf16, #tpu.memory_space<vmem>>, %arg15: memref<8x16xbf16, #tpu.memory_space<vmem>>, %arg16: memref<8x1xf32, #tpu.memory_space<vmem>>, %arg17: memref<8x1xf32, #tpu.memory_space<vmem>>, %arg18: memref<8x16xf32, #tpu.memory_space<vmem>>, %arg19: memref<8x64xf32, #tpu.memory_space<vmem>>) attributes {dimension_semantics = [#tpu.dimension_semantics<parallel>, #tpu.dimension_semantics<parallel>, #tpu.dimension_semantics<arbitrary>, #tpu.dimension_semantics<arbitrary>], iteration_bounds = array<i64: 2, 2, 4, 2>, scalar_prefetch = 0 : i64, scratch_operands = 6 : i64, tpu.core_type = #tpu.core_type<tc>, window_params = [{transform_indices = @transform_0, window_bounds = array<i64: 1, 8, 64>}, {transform_indices = @transform_1, window_bounds = array<i64: 1, 8, 64>}, {pipeline_mode = #tpu.pipeline_mode<synchronous>, transform_indices = @transform_2, window_bounds = array<i64: 1, 64>}, {pipeline_mode = #tpu.pipeline_mode<synchronous>, transform_indices = @transform_3, window_bounds = array<i64: 1, 64>}, {transform_indices = @transform_4, window_bounds = array<i64: 1, 64, 16>}, {transform_indices = @transform_5, window_bounds = array<i64: 1, 64, 16>}, {transform_indices = @transform_6, window_bounds = array<i64: 1, 64, 16>}, {transform_indices = @transform_7, window_bounds = array<i64: 1, 16, 64>}, {pipeline_mode = #tpu.pipeline_mode<synchronous>, transform_indices = @transform_8, window_bounds = array<i64: 1, 64>}, {transform_indices = @transform_9, window_bounds = array<i64: 1, 8, 64>}]} {
    %c0_i32 = arith.constant 0 : i32
    %0 = arith.cmpi eq, %arg2, %c0_i32 : i32
    %c0_i32_0 = arith.constant 0 : i32
    %1 = arith.cmpi eq, %arg3, %c0_i32_0 : i32
    %2 = arith.andi %0, %1 : i1
    %3 = arith.extui %2 : i1 to i32
    %c0_i32_1 = arith.constant 0 : i32
    %4 = arith.cmpi ne, %3, %c0_i32_1 : i32
    scf.if %4 {
      %c0_44 = arith.constant 0 : index
      %c0_45 = arith.constant 0 : index
      %c0_46 = arith.constant 0 : index
      %78 = vector.load %arg4[%c0_44, %c0_45, %c0_46] : memref<1x8x64xf32, #tpu.memory_space<vmem>>, vector<1x8x64xf32>
      %79 = vector.shape_cast %78 : vector<1x8x64xf32> to vector<8x64xf32>
      %c0_47 = arith.constant 0 : index
      %c0_48 = arith.constant 0 : index
      %80 = vector.load %arg6[%c0_47, %c0_48] : memref<1x64xf32, #tpu.memory_space<vmem>>, vector<1x64xf32>
      %c0_49 = arith.constant 0 : index
      %c0_50 = arith.constant 0 : index
      %81 = vector.load %arg7[%c0_49, %c0_50] : memref<1x64xf32, #tpu.memory_space<vmem>>, vector<1x64xf32>
      %cst_51 = arith.constant dense<0.000000e+00> : vector<8xf32>
      %82 = vector.multi_reduction <add>, %79, %cst_51 [1] : vector<8x64xf32> to vector<8xf32>
      %83 = vector.shape_cast %82 : vector<8xf32> to vector<8x1xf32>
      %cst_52 = arith.constant 6.400000e+01 : f32
      %84 = vector.broadcast %cst_52 : f32 to vector<8x1xf32>
      %85 = arith.divf %83, %84 : vector<8x1xf32>
      %86 = vector.broadcast %85 : vector<8x1xf32> to vector<8x64xf32>
      %87 = arith.subf %79, %86 : vector<8x64xf32>
      %88 = arith.mulf %87, %87 : vector<8x64xf32>
      %cst_53 = arith.constant dense<0.000000e+00> : vector<8xf32>
      %89 = vector.multi_reduction <add>, %88, %cst_53 [1] : vector<8x64xf32> to vector<8xf32>
      %90 = vector.shape_cast %89 : vector<8xf32> to vector<8x1xf32>
      %cst_54 = arith.constant 6.400000e+01 : f32
      %91 = vector.broadcast %cst_54 : f32 to vector<8x1xf32>
      %92 = arith.divf %90, %91 : vector<8x1xf32>
      %93 = vector.broadcast %85 : vector<8x1xf32> to vector<8x64xf32>
      %94 = arith.subf %79, %93 : vector<8x64xf32>
      %cst_55 = arith.constant 9.99999974E-6 : f32
      %95 = vector.broadcast %cst_55 : f32 to vector<8x1xf32>
      %96 = arith.addf %92, %95 : vector<8x1xf32>
      %97 = math.rsqrt %96 : vector<8x1xf32>
      %98 = vector.broadcast %97 : vector<8x1xf32> to vector<8x64xf32>
      %99 = arith.mulf %94, %98 : vector<8x64xf32>
      %100 = vector.broadcast %80 : vector<1x64xf32> to vector<8x64xf32>
      %101 = arith.mulf %99, %100 : vector<8x64xf32>
      %102 = vector.broadcast %81 : vector<1x64xf32> to vector<8x64xf32>
      %103 = arith.addf %101, %102 : vector<8x64xf32>
      %104 = arith.truncf %103 : vector<8x64xf32> to vector<8x64xbf16>
      %c0_56 = arith.constant 0 : index
      %c0_57 = arith.constant 0 : index
      %105 = vector.load %arg14[%c0_56, %c0_57] : memref<8x64xbf16, #tpu.memory_space<vmem>>, vector<8x64xbf16>
      tpu.vector_store %arg14[%c0_56, %c0_57], %104 {strides = array<i32>} : memref<8x64xbf16, #tpu.memory_space<vmem>>, vector<8x64xbf16>,
      %cst_58 = arith.constant 0.000000e+00 : f32
      %106 = vector.broadcast %cst_58 : f32 to vector<8x64xf32>
      %c0_59 = arith.constant 0 : index
      %c0_60 = arith.constant 0 : index
      %107 = vector.load %arg19[%c0_59, %c0_60] : memref<8x64xf32, #tpu.memory_space<vmem>>, vector<8x64xf32>
      tpu.vector_store %arg19[%c0_59, %c0_60], %106 {strides = array<i32>} : memref<8x64xf32, #tpu.memory_space<vmem>>, vector<8x64xf32>,
    } else {
    }
    %c0_i32_2 = arith.constant 0 : i32
    %5 = arith.cmpi eq, %arg3, %c0_i32_2 : i32
    %6 = arith.extui %5 : i1 to i32
    %c0_i32_3 = arith.constant 0 : i32
    %7 = arith.cmpi ne, %6, %c0_i32_3 : i32
    scf.if %7 {
      %c0_44 = arith.constant 0 : index
      %c0_45 = arith.constant 0 : index
      %78 = vector.load %arg14[%c0_44, %c0_45] : memref<8x64xbf16, #tpu.memory_space<vmem>>, vector<8x64xbf16>
      %c0_46 = arith.constant 0 : index
      %c0_47 = arith.constant 0 : index
      %c0_48 = arith.constant 0 : index
      %79 = vector.load %arg8[%c0_46, %c0_47, %c0_48] : memref<1x64x16xbf16, #tpu.memory_space<vmem>>, vector<1x64x16xbf16>
      %80 = vector.shape_cast %79 : vector<1x64x16xbf16> to vector<64x16xbf16>
      %cst_49 = arith.constant dense<0.000000e+00> : vector<8x16xf32>
      %81 = tpu.matmul %78, %80, %cst_49 {dimension_numbers = #tpu.dot_dimension_numbers<[1], [0], [0], [1], [0, 0, 1, 1], [], []>} : vector<8x64xbf16>, vector<64x16xbf16>, vector<8x16xf32> -> vector<8x16xf32>
      %82 = arith.truncf %81 : vector<8x16xf32> to vector<8x16xbf16>
      %c0_50 = arith.constant 0 : index
      %c0_51 = arith.constant 0 : index
      %83 = vector.load %arg15[%c0_50, %c0_51] : memref<8x16xbf16, #tpu.memory_space<vmem>>, vector<8x16xbf16>
      tpu.vector_store %arg15[%c0_50, %c0_51], %82 {strides = array<i32>} : memref<8x16xbf16, #tpu.memory_space<vmem>>, vector<8x16xbf16>,
      %cst_52 = arith.constant 0xFF800000 : f32
      %84 = vector.broadcast %cst_52 : f32 to vector<8x1xf32>
      %c0_53 = arith.constant 0 : index
      %c0_54 = arith.constant 0 : index
      %85 = vector.load %arg16[%c0_53, %c0_54] : memref<8x1xf32, #tpu.memory_space<vmem>>, vector<8x1xf32>
      tpu.vector_store %arg16[%c0_53, %c0_54], %84 {strides = array<i32>} : memref<8x1xf32, #tpu.memory_space<vmem>>, vector<8x1xf32>,
      %cst_55 = arith.constant 0.000000e+00 : f32
      %86 = vector.broadcast %cst_55 : f32 to vector<8x1xf32>
      %c0_56 = arith.constant 0 : index
      %c0_57 = arith.constant 0 : index
      %87 = vector.load %arg17[%c0_56, %c0_57] : memref<8x1xf32, #tpu.memory_space<vmem>>, vector<8x1xf32>
      tpu.vector_store %arg17[%c0_56, %c0_57], %86 {strides = array<i32>} : memref<8x1xf32, #tpu.memory_space<vmem>>, vector<8x1xf32>,
      %cst_58 = arith.constant 0.000000e+00 : f32
      %88 = vector.broadcast %cst_58 : f32 to vector<8x16xf32>
      %c0_59 = arith.constant 0 : index
      %c0_60 = arith.constant 0 : index
      %89 = vector.load %arg18[%c0_59, %c0_60] : memref<8x16xf32, #tpu.memory_space<vmem>>, vector<8x16xf32>
      tpu.vector_store %arg18[%c0_59, %c0_60], %88 {strides = array<i32>} : memref<8x16xf32, #tpu.memory_space<vmem>>, vector<8x16xf32>,
    } else {
    }
    %c0 = arith.constant 0 : index
    %c0_4 = arith.constant 0 : index
    %c0_5 = arith.constant 0 : index
    %8 = vector.load %arg5[%c0, %c0_4, %c0_5] : memref<1x8x64xf32, #tpu.memory_space<vmem>>, vector<1x8x64xf32>
    %9 = vector.shape_cast %8 : vector<1x8x64xf32> to vector<8x64xf32>
    %c0_6 = arith.constant 0 : index
    %c0_7 = arith.constant 0 : index
    %10 = vector.load %arg6[%c0_6, %c0_7] : memref<1x64xf32, #tpu.memory_space<vmem>>, vector<1x64xf32>
    %c0_8 = arith.constant 0 : index
    %c0_9 = arith.constant 0 : index
    %11 = vector.load %arg7[%c0_8, %c0_9] : memref<1x64xf32, #tpu.memory_space<vmem>>, vector<1x64xf32>
    %cst = arith.constant dense<0.000000e+00> : vector<8xf32>
    %12 = vector.multi_reduction <add>, %9, %cst [1] : vector<8x64xf32> to vector<8xf32>
    %13 = vector.shape_cast %12 : vector<8xf32> to vector<8x1xf32>
    %cst_10 = arith.constant 6.400000e+01 : f32
    %14 = vector.broadcast %cst_10 : f32 to vector<8x1xf32>
    %15 = arith.divf %13, %14 : vector<8x1xf32>
    %16 = vector.broadcast %15 : vector<8x1xf32> to vector<8x64xf32>
    %17 = arith.subf %9, %16 : vector<8x64xf32>
    %18 = arith.mulf %17, %17 : vector<8x64xf32>
    %cst_11 = arith.constant dense<0.000000e+00> : vector<8xf32>
    %19 = vector.multi_reduction <add>, %18, %cst_11 [1] : vector<8x64xf32> to vector<8xf32>
    %20 = vector.shape_cast %19 : vector<8xf32> to vector<8x1xf32>
    %cst_12 = arith.constant 6.400000e+01 : f32
    %21 = vector.broadcast %cst_12 : f32 to vector<8x1xf32>
    %22 = arith.divf %20, %21 : vector<8x1xf32>
    %23 = vector.broadcast %15 : vector<8x1xf32> to vector<8x64xf32>
    %24 = arith.subf %9, %23 : vector<8x64xf32>
    %cst_13 = arith.constant 9.99999974E-6 : f32
    %25 = vector.broadcast %cst_13 : f32 to vector<8x1xf32>
    %26 = arith.addf %22, %25 : vector<8x1xf32>
    %27 = math.rsqrt %26 : vector<8x1xf32>
    %28 = vector.broadcast %27 : vector<8x1xf32> to vector<8x64xf32>
    %29 = arith.mulf %24, %28 : vector<8x64xf32>
    %30 = vector.broadcast %10 : vector<1x64xf32> to vector<8x64xf32>
    %31 = arith.mulf %29, %30 : vector<8x64xf32>
    %32 = vector.broadcast %11 : vector<1x64xf32> to vector<8x64xf32>
    %33 = arith.addf %31, %32 : vector<8x64xf32>
    %34 = arith.truncf %33 : vector<8x64xf32> to vector<8x64xbf16>
    %c0_14 = arith.constant 0 : index
    %c0_15 = arith.constant 0 : index
    %c0_16 = arith.constant 0 : index
    %35 = vector.load %arg9[%c0_14, %c0_15, %c0_16] : memref<1x64x16xbf16, #tpu.memory_space<vmem>>, vector<1x64x16xbf16>
    %36 = vector.shape_cast %35 : vector<1x64x16xbf16> to vector<64x16xbf16>
    %cst_17 = arith.constant dense<0.000000e+00> : vector<8x16xf32>
    %37 = tpu.matmul %34, %36, %cst_17 {dimension_numbers = #tpu.dot_dimension_numbers<[1], [0], [0], [1], [0, 0, 1, 1], [], []>} : vector<8x64xbf16>, vector<64x16xbf16>, vector<8x16xf32> -> vector<8x16xf32>
    %38 = arith.truncf %37 : vector<8x16xf32> to vector<8x16xbf16>
    %c0_18 = arith.constant 0 : index
    %c0_19 = arith.constant 0 : index
    %c0_20 = arith.constant 0 : index
    %39 = vector.load %arg10[%c0_18, %c0_19, %c0_20] : memref<1x64x16xbf16, #tpu.memory_space<vmem>>, vector<1x64x16xbf16>
    %40 = vector.shape_cast %39 : vector<1x64x16xbf16> to vector<64x16xbf16>
    %cst_21 = arith.constant dense<0.000000e+00> : vector<8x16xf32>
    %41 = tpu.matmul %34, %40, %cst_21 {dimension_numbers = #tpu.dot_dimension_numbers<[1], [0], [0], [1], [0, 0, 1, 1], [], []>} : vector<8x64xbf16>, vector<64x16xbf16>, vector<8x16xf32> -> vector<8x16xf32>
    %42 = arith.truncf %41 : vector<8x16xf32> to vector<8x16xbf16>
    %c0_22 = arith.constant 0 : index
    %c0_23 = arith.constant 0 : index
    %43 = vector.load %arg15[%c0_22, %c0_23] : memref<8x16xbf16, #tpu.memory_space<vmem>>, vector<8x16xbf16>
    %cst_24 = arith.constant dense<0.000000e+00> : vector<8x8xf32>
    %44 = tpu.matmul %43, %38, %cst_24 {dimension_numbers = #tpu.dot_dimension_numbers<[1], [1], [0], [0], [0, 0, 1, 0], [], []>} : vector<8x16xbf16>, vector<8x16xbf16>, vector<8x8xf32> -> vector<8x8xf32>
    %cst_25 = arith.constant 2.500000e-01 : f32
    %45 = vector.broadcast %cst_25 : f32 to vector<8x8xf32>
    %46 = arith.mulf %44, %45 : vector<8x8xf32>
    %c0_26 = arith.constant 0 : index
    %c0_27 = arith.constant 0 : index
    %47 = vector.load %arg16[%c0_26, %c0_27] : memref<8x1xf32, #tpu.memory_space<vmem>>, vector<8x1xf32>
    %cst_28 = arith.constant dense<0xFF800000> : vector<8xf32>
    %48 = vector.multi_reduction <maximumf>, %46, %cst_28 [1] : vector<8x8xf32> to vector<8xf32>
    %49 = vector.shape_cast %48 : vector<8xf32> to vector<8x1xf32>
    %50 = arith.maximumf %47, %49 : vector<8x1xf32>
    %51 = arith.subf %47, %50 : vector<8x1xf32>
    %52 = math.exp %51 : vector<8x1xf32>
    %53 = vector.broadcast %50 : vector<8x1xf32> to vector<8x8xf32>
    %54 = arith.subf %46, %53 : vector<8x8xf32>
    %55 = math.exp %54 : vector<8x8xf32>
    %c0_29 = arith.constant 0 : index
    %c0_30 = arith.constant 0 : index
    %56 = vector.load %arg17[%c0_29, %c0_30] : memref<8x1xf32, #tpu.memory_space<vmem>>, vector<8x1xf32>
    %57 = arith.mulf %52, %56 : vector<8x1xf32>
    %cst_31 = arith.constant dense<0.000000e+00> : vector<8xf32>
    %58 = vector.multi_reduction <add>, %55, %cst_31 [1] : vector<8x8xf32> to vector<8xf32>
    %59 = vector.shape_cast %58 : vector<8xf32> to vector<8x1xf32>
    %60 = arith.addf %57, %59 : vector<8x1xf32>
    %c0_32 = arith.constant 0 : index
    %c0_33 = arith.constant 0 : index
    %61 = vector.load %arg17[%c0_32, %c0_33] : memref<8x1xf32, #tpu.memory_space<vmem>>, vector<8x1xf32>
    tpu.vector_store %arg17[%c0_32, %c0_33], %60 {strides = array<i32>} : memref<8x1xf32, #tpu.memory_space<vmem>>, vector<8x1xf32>,
    %c0_34 = arith.constant 0 : index
    %c0_35 = arith.constant 0 : index
    %62 = vector.load %arg18[%c0_34, %c0_35] : memref<8x16xf32, #tpu.memory_space<vmem>>, vector<8x16xf32>
    %63 = vector.broadcast %52 : vector<8x1xf32> to vector<8x16xf32>
    %64 = arith.mulf %63, %62 : vector<8x16xf32>
    %65 = arith.truncf %55 : vector<8x8xf32> to vector<8x8xbf16>
    %cst_36 = arith.constant dense<0.000000e+00> : vector<8x16xf32>
    %66 = tpu.matmul %65, %42, %cst_36 {dimension_numbers = #tpu.dot_dimension_numbers<[1], [0], [0], [1], [0, 0, 1, 1], [], []>} : vector<8x8xbf16>, vector<8x16xbf16>, vector<8x16xf32> -> vector<8x16xf32>
    %67 = arith.addf %64, %66 : vector<8x16xf32>
    %c0_37 = arith.constant 0 : index
    %c0_38 = arith.constant 0 : index
    %68 = vector.load %arg18[%c0_37, %c0_38] : memref<8x16xf32, #tpu.memory_space<vmem>>, vector<8x16xf32>
    tpu.vector_store %arg18[%c0_37, %c0_38], %67 {strides = array<i32>} : memref<8x16xf32, #tpu.memory_space<vmem>>, vector<8x16xf32>,
    %c0_39 = arith.constant 0 : index
    %c0_40 = arith.constant 0 : index
    %69 = vector.load %arg16[%c0_39, %c0_40] : memref<8x1xf32, #tpu.memory_space<vmem>>, vector<8x1xf32>
    tpu.vector_store %arg16[%c0_39, %c0_40], %50 {strides = array<i32>} : memref<8x1xf32, #tpu.memory_space<vmem>>, vector<8x1xf32>,
    %c1_i32 = arith.constant 1 : i32
    %70 = arith.cmpi eq, %arg3, %c1_i32 : i32
    %71 = arith.extui %70 : i1 to i32
    %c0_i32_41 = arith.constant 0 : i32
    %72 = arith.cmpi ne, %71, %c0_i32_41 : i32
    scf.if %72 {
      %c0_44 = arith.constant 0 : index
      %c0_45 = arith.constant 0 : index
      %78 = vector.load %arg18[%c0_44, %c0_45] : memref<8x16xf32, #tpu.memory_space<vmem>>, vector<8x16xf32>
      %c0_46 = arith.constant 0 : index
      %c0_47 = arith.constant 0 : index
      %79 = vector.load %arg17[%c0_46, %c0_47] : memref<8x1xf32, #tpu.memory_space<vmem>>, vector<8x1xf32>
      %80 = tpu.reciprocal %79 {approx = true} : vector<8x1xf32> -> vector<8x1xf32>
      %81 = vector.broadcast %80 : vector<8x1xf32> to vector<8x16xf32>
      %82 = arith.mulf %78, %81 : vector<8x16xf32>
      %c0_48 = arith.constant 0 : index
      %c0_49 = arith.constant 0 : index
      %83 = vector.load %arg19[%c0_48, %c0_49] : memref<8x64xf32, #tpu.memory_space<vmem>>, vector<8x64xf32>
      %84 = arith.truncf %82 : vector<8x16xf32> to vector<8x16xbf16>
      %c0_50 = arith.constant 0 : index
      %c0_51 = arith.constant 0 : index
      %c0_52 = arith.constant 0 : index
      %85 = vector.load %arg11[%c0_50, %c0_51, %c0_52] : memref<1x16x64xbf16, #tpu.memory_space<vmem>>, vector<1x16x64xbf16>
      %86 = vector.shape_cast %85 : vector<1x16x64xbf16> to vector<16x64xbf16>
      %cst_53 = arith.constant dense<0.000000e+00> : vector<8x64xf32>
      %87 = tpu.matmul %84, %86, %cst_53 {dimension_numbers = #tpu.dot_dimension_numbers<[1], [0], [0], [1], [0, 0, 1, 1], [], []>} : vector<8x16xbf16>, vector<16x64xbf16>, vector<8x64xf32> -> vector<8x64xf32>
      %88 = arith.addf %83, %87 : vector<8x64xf32>
      %c0_54 = arith.constant 0 : index
      %c0_55 = arith.constant 0 : index
      %89 = vector.load %arg19[%c0_54, %c0_55] : memref<8x64xf32, #tpu.memory_space<vmem>>, vector<8x64xf32>
      tpu.vector_store %arg19[%c0_54, %c0_55], %88 {strides = array<i32>} : memref<8x64xf32, #tpu.memory_space<vmem>>, vector<8x64xf32>,
    } else {
    }
    %c3_i32 = arith.constant 3 : i32
    %73 = arith.cmpi eq, %arg2, %c3_i32 : i32
    %c1_i32_42 = arith.constant 1 : i32
    %74 = arith.cmpi eq, %arg3, %c1_i32_42 : i32
    %75 = arith.andi %73, %74 : i1
    %76 = arith.extui %75 : i1 to i32
    %c0_i32_43 = arith.constant 0 : i32
    %77 = arith.cmpi ne, %76, %c0_i32_43 : i32
    scf.if %77 {
      %c0_44 = arith.constant 0 : index
      %c0_45 = arith.constant 0 : index
      %78 = vector.load %arg19[%c0_44, %c0_45] : memref<8x64xf32, #tpu.memory_space<vmem>>, vector<8x64xf32>
      %c0_46 = arith.constant 0 : index
      %c0_47 = arith.constant 0 : index
      %79 = vector.load %arg12[%c0_46, %c0_47] : memref<1x64xf32, #tpu.memory_space<vmem>>, vector<1x64xf32>
      %80 = vector.broadcast %79 : vector<1x64xf32> to vector<8x64xf32>
      %81 = arith.addf %78, %80 : vector<8x64xf32>
      %c0_48 = arith.constant 0 : index
      %c0_49 = arith.constant 0 : index
      %c0_50 = arith.constant 0 : index
      %82 = vector.load %arg4[%c0_48, %c0_49, %c0_50] : memref<1x8x64xf32, #tpu.memory_space<vmem>>, vector<1x8x64xf32>
      %83 = vector.shape_cast %82 : vector<1x8x64xf32> to vector<8x64xf32>
      %84 = arith.addf %81, %83 : vector<8x64xf32>
      %c0_51 = arith.constant 0 : index
      %c0_52 = arith.constant 0 : index
      %c0_53 = arith.constant 0 : index
      %85 = vector.load %arg13[%c0_51, %c0_52, %c0_53] : memref<1x8x64xf32, #tpu.memory_space<vmem>>, vector<1x8x64xf32>
      %86 = vector.shape_cast %85 : vector<1x8x64xf32> to vector<8x64xf32>
      %87 = vector.shape_cast %84 : vector<8x64xf32> to vector<1x8x64xf32>
      tpu.vector_store %arg13[%c0_51, %c0_52, %c0_53], %87 {strides = array<i32>} : memref<1x8x64xf32, #tpu.memory_space<vmem>>, vector<1x8x64xf32>,
    } else {
    }
    return
  }
  func.func @transform_0(%arg0: i32, %arg1: i32, %arg2: i32, %arg3: i32) -> (i32, i32, i32) {
    %c0_i32 = arith.constant 0 : i32
    %c0_i32_0 = arith.constant 0 : i32
    return %arg0, %arg1, %c0_i32 : i32, i32, i32
  }
  func.func @transform_1(%arg0: i32, %arg1: i32, %arg2: i32, %arg3: i32) -> (i32, i32, i32) {
    %c0_i32 = arith.constant 0 : i32
    %c0_i32_0 = arith.constant 0 : i32
    return %arg0, %arg3, %c0_i32 : i32, i32, i32
  }
  func.func @transform_2(%arg0: i32, %arg1: i32, %arg2: i32, %arg3: i32) -> (i32, i32) {
    %c0_i32 = arith.constant 0 : i32
    %c0_i32_0 = arith.constant 0 : i32
    %c0_i32_1 = arith.constant 0 : i32
    return %c0_i32, %c0_i32_0 : i32, i32
  }
  func.func @transform_3(%arg0: i32, %arg1: i32, %arg2: i32, %arg3: i32) -> (i32, i32) {
    %c0_i32 = arith.constant 0 : i32
    %c0_i32_0 = arith.constant 0 : i32
    %c0_i32_1 = arith.constant 0 : i32
    return %c0_i32, %c0_i32_0 : i32, i32
  }
  func.func @transform_4(%arg0: i32, %arg1: i32, %arg2: i32, %arg3: i32) -> (i32, i32, i32) {
    %c0_i32 = arith.constant 0 : i32
    %c0_i32_0 = arith.constant 0 : i32
    %c0_i32_1 = arith.constant 0 : i32
    return %arg2, %c0_i32, %c0_i32_0 : i32, i32, i32
  }
  func.func @transform_5(%arg0: i32, %arg1: i32, %arg2: i32, %arg3: i32) -> (i32, i32, i32) {
    %c0_i32 = arith.constant 0 : i32
    %c0_i32_0 = arith.constant 0 : i32
    %c0_i32_1 = arith.constant 0 : i32
    return %arg2, %c0_i32, %c0_i32_0 : i32, i32, i32
  }
  func.func @transform_6(%arg0: i32, %arg1: i32, %arg2: i32, %arg3: i32) -> (i32, i32, i32) {
    %c0_i32 = arith.constant 0 : i32
    %c0_i32_0 = arith.constant 0 : i32
    %c0_i32_1 = arith.constant 0 : i32
    return %arg2, %c0_i32, %c0_i32_0 : i32, i32, i32
  }
  func.func @transform_7(%arg0: i32, %arg1: i32, %arg2: i32, %arg3: i32) -> (i32, i32, i32) {
    %c0_i32 = arith.constant 0 : i32
    %c0_i32_0 = arith.constant 0 : i32
    %c0_i32_1 = arith.constant 0 : i32
    return %arg2, %c0_i32, %c0_i32_0 : i32, i32, i32
  }
  func.func @transform_8(%arg0: i32, %arg1: i32, %arg2: i32, %arg3: i32) -> (i32, i32) {
    %c0_i32 = arith.constant 0 : i32
    %c0_i32_0 = arith.constant 0 : i32
    %c0_i32_1 = arith.constant 0 : i32
    return %c0_i32, %c0_i32_0 : i32, i32
  }
  func.func @transform_9(%arg0: i32, %arg1: i32, %arg2: i32, %arg3: i32) -> (i32, i32, i32) {
    %c0_i32 = arith.constant 0 : i32
    %c0_i32_0 = arith.constant 0 : i32
    return %arg0, %arg1, %c0_i32 : i32, i32, i32
  }
}

</mosaic_0001>

<bundles_post_ra>
// kernel: tpu_custom_call.1
= control target key start
LH: loop header
LB: loop body
LE: loop exit
PB: predicated region body
PF: predicated region fallthrough
CT: control target
= control target key end

     0   :  { %s1909_s0 = inlined_call_operand.vmem [shape: f32[2,16,64], index: 0, kind: input, shape index: {}]   ;;  %s1910_s1 = inlined_call_operand.vmem [shape: f32[2,16,64], index: 1, kind: input, shape index: {}]   ;;  %s1911_s2 = inlined_call_operand.vmem [shape: f32[1,64], index: 2, kind: input, shape index: {}]   ;;  %s1912_s3 = inlined_call_operand.vmem [shape: f32[1,64], index: 3, kind: input, shape index: {}]   ;;  %s1913_s4 = inlined_call_operand.vmem [shape: bf16[4,64,16], index: 4, kind: input, shape index: {}]   ;;  %s1914_s5 = inlined_call_operand.vmem [shape: bf16[4,64,16], index: 5, kind: input, shape index: {}]   ;;  %s1915_s6 = inlined_call_operand.vmem [shape: bf16[4,64,16], index: 6, kind: input, shape index: {}]   ;;  %s1916_s7 = inlined_call_operand.vmem [shape: bf16[4,16,64], index: 7, kind: input, shape index: {}]   ;;  %s1917_s8 = inlined_call_operand.vmem [shape: f32[1,64], index: 8, kind: input, shape index: {}]   ;;  %s1918_s9 = inlined_call_operand.hbm [shape: f32[2,16,64], index: 9, kind: output, shape index: {}]  }
   0x1   :  { %1935 = sst [smem:[#allocation26_spill]] %s1909_s0 }
   0x2   :  { %1936 = sst [smem:[#allocation27_spill]] %s1918_s9 }
   0x3   :  { %14 = vsyncpa [#allocation9], 0 }
   0x4   :  { %16 = vsyncpa [#allocation9 + $0x1], 0  ;;  %s1639_s30 = smov 0   ;;  %s1641_s10 = smov 0  }
   0x5   :  { %s1643_s11 = smov 0   ;;  %s1645_s12 = smov 0  }
   0x6   :  { %s1647_s13 = smov 0   ;;  %s1649_s14 = smov 0  }
   0x7   :  { %s1651_s15 = smov 0   ;;  %s1653_s16 = smov 0  }
   0x8   :  { %s1655_s17 = smov 0   ;;  %s1657_s18 = smov 0  }
   0x9   :  { %s1659_s19 = smov 0   ;;  %s1661_s20 = smov 0  }
   0xa LB: > { %1937 = sst [smem:[#allocation11_spill]] %s1532_s30  ;;  %s1183_s21 = sadd.s32 4294967295, %s1576_s20   ;;  %s1576_s20 = sphi %s1661_s20, %s22_s20   ;;  %s1572_s19 = sphi %s1659_s19, %s1973_s19   ;;  %s1568_s18 = sphi %s1657_s18, %s1972_s18   ;;  %s1564_s17 = sphi %s1655_s17, %s1971_s17   ;;  %s1560_s16 = sphi %s1653_s16, %s1970_s16   ;;  %s1556_s15 = sphi %s1651_s15, %s1969_s15   ;;  %s1552_s14 = sphi %s1649_s14, %s1968_s14   ;;  %s1548_s13 = sphi %s1647_s13, %s1967_s13   ;;  %s1544_s12 = sphi %s1645_s12, %s1966_s12   ;;  %s1540_s11 = sphi %s1643_s11, %s1965_s11   ;;  %s1536_s10 = sphi %s1641_s10, %s1964_s10   ;;  %s1532_s30 = sphi %s1639_s30, %s1963_s30  }
   0xb   : > { %1938 = sst [smem:[#allocation12_spill]] %s1536_s10  ;;  %s1184_s22 = sadd.s32 4294967294, %s1576_s20  }
   0xc   : > { %1939 = sst [smem:[#allocation13_spill]] %s1540_s11  ;;  %s37_s23 = sadd.s32 1, %s1560_s16 }
   0xd   : > { %1940 = sst [smem:[#allocation14_spill]] %s1560_s16  ;;  %p38_p0 = scmp.ge.s32.totalorder %s37_s23, 2 }
   0xe   : > { %1941 = sst [smem:[#allocation15_spill]] %s1564_s17  ;;  %s40_s24 = sadd.s32 1, %s1564_s17 }
   0xf   : > { %1942 = sst [smem:[#allocation16_spill]] %s1568_s18  ;;  %s44_s25 = sadd.s32 1, %s1568_s18 }
  0x10   : > { %1943 = sst [smem:[#allocation17_spill]] %s1572_s19  ;;  %s48_s26 = sadd.s32 1, %s1572_s19 }
  0x11   : > { %1944 = sst [smem:[#allocation18_spill]] %s1576_s20  ;;  %s1975_s23 = smov (%p38_p0, %s37_s23), 0 }
  0x12   : > { %1945 = sst [smem:[#allocation19_spill]] %s1975_s23  ;;  %s1977_s24 = smov (!%p38_p0, %s40_s24), %s1564_s17 }
  0x13   : > { %p290_p1 = scmp.ne.s32.totalorder %s1540_s11, %s1536_s10  ;;  %p291_p2 = scmp.eq.s32.totalorder %s1183_s21, 31 }
  0x14   : > { %p42_p3 = scmp.ge.s32.totalorder %s1977_s24, 4  ;;  %p296_p4 = scmp.ne.s32.totalorder %s1536_s10, %s1532_s30 }
  0x15   : > { %p1712_p5 = por %p291_p2, %p290_p1  ;;  %p297_p6 = scmp.eq.s32.totalorder %s1184_s22, 31 }
  0x16   : > { %s1979_s24 = smov (%p42_p3, %s1977_s24), 0  ;;  %s1981_s25 = smov (!%p42_p3, %s44_s25), %s1568_s18 }
  0x17   : > { %s1946_s27 = scalar_select %p1712_p5, 1, 0 }
  0x18   : > { %1948 = sst [smem:[#allocation21_spill]] %s1979_s24  ;;  %p1719_p7 = por %p297_p6, %p296_p4 }
  0x19   : > { %1947 = sst [smem:[#allocation20_spill]] %s1946_s27  ;;  %p1187_p8 = scmp.ge.s32.totalorder %s1576_s20, 1 }
  0x1a   : > { %s1949_s28 = scalar_select %p1719_p7, 1, 0 }
  0x1b   : > { %p46_p9 = scmp.ge.s32.totalorder %s1981_s25, 2  ;;  %p378_p10 = scmp.lt.s32.totalorder %s1576_s20, 33 }
  0x1c   : > { %1950 = sst [smem:[#allocation22_spill]] %s1949_s28  ;;  %s280_s24 = sadd.s32 1, %s1540_s11 }
  0x1d   : > { %s1983_s25 = smov (%p46_p9, %s1981_s25), 0  ;;  %s1985_s26 = smov (!%p46_p9, %s48_s26), %s1572_s19 }
  0x1e   : > { %1951 = sst [smem:[#allocation23_spill]] %s1983_s25  ;;  %p379_p11 = pnand %p1187_p8, %p378_p10 }
  0x1f   : > { %p50_p12 = scmp.ge.s32.totalorder %s1985_s26, 2  ;;  %s276_s29 = ssub.s32 %s1568_s18, %s1983_s25 }
  0x20   : > { %s1926_s25 = sand.u32 (!%p379_p11), 1, %s1536_s10   ;;  %p445_p0 = scmp.lt.s32.totalorder (!%p379_p11), %s1556_s15, 1 }
  0x21   : > { %s1987_s26 = smov (%p50_p12, %s1985_s26), 0  ;;  %p447_p1 = scmp.lt.s32.totalorder (!%p379_p11), %s1552_s14, 1 }
  0x22   : > { %1952 = sst [smem:[#allocation24_spill]] %s1987_s26  ;;  %s275_s21 = ssub.s32 %s1572_s19, %s1987_s26 }
  0x23   : > { %s277_s22 = sor.u32 %s276_s29, %s275_s21  ;;  %382 = sbr.rel (%p379_p11) target bundleno = 2189 (0x88d), region = 56 }
  0x24   : > { %p278_p13 = scmp.eq.s32.totalorder %s277_s22, 0  ;;  %s1742_s29 = sshll.u32 (!%p379_p11), %s1926_s25, 3 }
  0x25   : > { %p455_p2 = scmp.lt.s32.totalorder (!%p379_p11), %s1544_s12, 1  ;;  %p461_p3 = scmp.lt.s32.totalorder (!%p379_p11), %s1548_s13, 3 }
  0x26   : > { %s1736_s23 = scalar_select %p278_p13, %s1540_s11, %s280_s24  }
  0x27   : > { %p482_p4 = scmp.eq.s32.totalorder (!%p379_p11), %s1548_s13, 0  ;;  %p483_p6 = scmp.eq.s32.totalorder (!%p379_p11), %s1544_s12, 0 }
  0x28   : > { %1953 = sst [smem:[#allocation25_spill]] %s1736_s23  ;;  %s1954_s0 = sld [smem:[#allocation26_spill]] (!%p379_p11) }
  0x29   : > { %p484_p8 = pnand (!%p379_p11), %p483_p6, %p482_p4 }
  0x2a   : > { %s446_s24 = scalar_select %p445_p0, %s1556_s15, 1 }
  0x2b   : > { %s448_s21 = scalar_select %p447_p1, %s1552_s14, 1 }
  0x2c   : > { %s1189_s22 = sshll.u32 %s446_s24, 1  ;;  %vm491_vm0 = vcmask (!%p484_p8), 523264   ;;  %v1578_v2 = vmov (!%p484_p8), 0.0   ;;  %v1201_v12 = vld [vmem:[%s1911_s2] ss:$0 sm:$0xff] (!%p484_p8)  ;;  %vm521_vm1 = vcmask (!%p484_p8), 519168  }
  0x2d   : > { %s450_s26 = sadd.s32 %s1189_s22, %s448_s21  ;;  %523 = vst.msk [vmem:[#allocation7] sm:$0xff] (!%p484_p8), %vm491_vm0, %v1578_v2  ;;  %v1202_v14 = vld [vmem:[%s1912_s3] ss:$0 sm:$0xff] (!%p484_p8) }
  0x2e   : > { %s1190_s19 = sshll.u32 %s450_s26, 3 }
  0x2f   : > { %s1754_s16 = scalar_lea.vmem %s1954_s0, %s1190_s19 }
  0x30   : > { %s456_s23 = scalar_select %p455_p2, %s1544_s12, 1 }
  0x31   : > { %s462_s11 = scalar_select %p461_p3, %s1548_s13, 3 }
  0x32   : > { %s458_s25 = sadd.s32 %s1189_s22, %s456_s23  ;;  %487 = sbr.rel (%p484_p8) target bundleno = 367 (0x16f), region = 60  ;;  %v488_v0 = vld [vmem:[%s1754_s16] sm:$0xff] (!%p484_p8) }
  0x33   : > { %s1192_s28 = sshll.u32 %s458_s25, 3  ;;  %s1232_s30 = sshll.u32 %s462_s11, 5  ;;  %v492_v1 = vsel (!%p484_p8), %vm491_vm0, %v488_v0, 0.0 }
  0x34   : > { %s1761_s24 = scalar_lea.vmem %s1910_s1, %s1192_s28  ;;  %s1766_s26 = scalar_lea.vmem %s1913_s4, %s1232_s30  ;;  %493 = vadd.xlane.f32.xlu0 (!%p484_p8), %v492_v1 }
  0x35   : > { %s1771_s18 = scalar_lea.vmem %s1914_s5, %s1232_s30  ;;  %s1776_s25 = scalar_lea.vmem %s1915_s6, %s1232_s30 }
  0x36   : > { %s1235_s22 = sshll.u32 %s462_s11, 3  ;;  %s444_s28 = scalar_lea.vmem [#allocation8], %s1742_s29 }
  0x37   : > { %s1781_s20 = scalar_lea.vmem %s1916_s7, %s1235_s22 }
  0xc1   : > { %v494_v3 = vpop.xlane.xlu0 %493 }
  0xc2   : > { %v496_v4 = vmul.f32 0.015625, %v494_v3 }
  0xc4   : > { %v497_v5 = vsub.f32 %v488_v0, %v496_v4 }
  0xc6   : > { %v498_v6 = vmul.f32 %v497_v5, %v497_v5 }
  0xc8   : > { %v499_v7 = vsel %vm491_vm0, %v498_v6, 0.0 }
  0xc9   : > { %500 = vadd.xlane.f32.xlu0 %v499_v7 }
 0x156   : > { %v501_v8 = vpop.xlane.xlu0 %500 }
 0x157   : > { %v502_v9 = vmul.f32 0.015625, %v501_v8 }
 0x159   : > { %v503_v10 = vadd.f32 1e-05, %v502_v9 }
 0x15b   : > { %1424 = vrsqrt.f32 %v503_v10 }
 0x165   : > { %v1425_v11 = vpop.eup %1424 }
 0x166   : > { %v505_v13 = vmul.f32 %v1425_v11, %v497_v5 }
 0x168   : > { %v512_v15 = vmul.f32 %v1201_v12, %v505_v13 }
 0x16a   : > { %v519_v16 = vadd.f32 %v1202_v14, %v512_v15 }
 0x16c   : > { %v520_v17 = vpack.c.bf16 %v519_v16, %v519_v16 }
 0x16e   : > { %522 = vst.msk [vmem:[#allocation2] sm:$0xf] %vm521_vm1, %v520_v17 }
 0x16f PF: > { %p1203_p9 = scmp.ne.s32.totalorder %s1544_s12, 0 }
 0x170   : > { %vm607_vm2 = vcmask (!%p1203_p9), 7168   ;;  %vm610_vm3 = vcmask (!%p1203_p9), 130048   ;;  %v1579_v18 = vmov (!%p1203_p9), 0.0   ;;  %v1580_v19 = vmov (!%p1203_p9), -inf   ;;  %v1426_v20 = vld [vmem:[%s1766_s26] sm:$0xff] (!%p1203_p9)   ;;  %v1427_v21 = vld [vmem:[%s1766_s26 + $0x8] sm:$0xff] (!%p1203_p9)  }
 0x171   : > { %526 = sbr.rel (%p1203_p9) target bundleno = 600 (0x258), region = 64  ;;  %1257 = vmatprep.subr.bf16.mxu0 (!%p1203_p9), %v1579_v18  ;;  %608 = vst.msk [vmem:[#allocation4] sm:$0xff] (!%p1203_p9), %vm607_vm2, %v1580_v19  ;;  %609 = vst.msk [vmem:[#allocation5] sm:$0xff] (!%p1203_p9), %vm607_vm2, %v1579_v18  ;;  %vm1581_vm4 = vmmov (!%p1203_p9), 0   ;;  %v1428_v22 = vld [vmem:[%s1766_s26 + $0x10] sm:$0xff] (!%p1203_p9)   ;;  %v1429_v23 = vld [vmem:[%s1766_s26 + $0x18] sm:$0xff] (!%p1203_p9)  }
 0x172   : > { %611 = vst.msk [vmem:[#allocation6] sm:$0xff] (!%p1203_p9), %vm610_vm3, %v1579_v18  ;;  %1265 = vmatprep.mubr.msk.bf16.mxu0 (!%p1203_p9), %vm1581_vm4, %v1579_v18  ;;  %1258 = vmatpush3.bf16.msra.mxu0 (!%p1203_p9), %v1426_v20  ;;  %vm560_vm5 = vcmask (!%p1203_p9), 523264   ;;  %vm605_vm6 = vcmask (!%p1203_p9), 125952  }
 0x173   : > { %1259 = vmatprep.subr.bf16.mxu0 (!%p1203_p9), %v1579_v18 }
 0x175   : > { %v527_v24 = vld [vmem:[#allocation2] sm:$0xf] (!%p1203_p9) }
 0x176   : > { %1260 = vmatpush3.bf16.msra.mxu0 (!%p1203_p9), %v1427_v21 }
 0x177   : > { %1261 = vmatprep.subr.bf16.mxu0 (!%p1203_p9), %v1579_v18 }
 0x17a   : > { %1262 = vmatpush3.bf16.msra.mxu0 %v1428_v22 }
 0x17b   : > { %1263 = vmatprep.subr.bf16.mxu0 %v1579_v18 }
 0x17e   : > { %1264 = vmatpush3.bf16.msra.mxu0 %v1429_v23 }
 0x181   : > { %1266 = vmatmul.mubr.msk.bf16.vlgmr.msra.gmra.mrb[0].mxu0 %vm560_vm5, %v527_v24 }
 0x254   : > { %v598_v25 = vpop.f32.mrb[0].mxu0 }
 0x255   : > { %v604_v26 = vpack.c.bf16 %v598_v25, %v598_v25  ;;  %v1267_v27 = vpop.f32.mrb[1].mxu0 }
 0x256   : > { %v601_v28 = vpop.f32.mrb[2].mxu0 }
 0x257   : > { %606 = vst.msk [vmem:[#allocation3] sm:$0xf] %vm605_vm6, %v604_v26  ;;  %v1268_v29 = vpop.f32.mrb[3].mxu0 }
 0x258 PF: > { %v612_v30 = vld [vmem:[%s1761_s24] sm:$0xff]  ;;  %vm615_vm7 = vcmask 523264   ;;  %v1582_v39 = vmov 0.0   ;;  %v1434_v40 = vld [vmem:[%s1771_s18 + $0x8] sm:$0xff]   ;;  %vm1583_vm8 = vmmov 0   ;;  %v1436_v42 = vld [vmem:[%s1771_s18 + $0x10] sm:$0xff]  }
 0x259   : > { %v616_v31 = vsel %vm615_vm7, %v612_v30, 0.0  ;;  %v1432_v37 = vld [vmem:[%s1771_s18] sm:$0xff]   ;;  %1269 = vmatprep.subr.bf16.mxu0 %v1582_v39  ;;  %1281 = vmatprep.subr.bf16.mxu1 %v1582_v39  ;;  %v1435_v41 = vld [vmem:[%s1776_s25 + $0x8] sm:$0xff]   ;;  %v1437_v43 = vld [vmem:[%s1776_s25 + $0x10] sm:$0xff]   ;;  %vm795_vm9 = vcmask 130048   ;;  %vm879_vm10 = vcmask 1043456  }
 0x25a   : > { %617 = vadd.xlane.f32.xlu0 %v616_v31  ;;  %v1433_v38 = vld [vmem:[%s1776_s25] sm:$0xff]   ;;  %1270 = vmatpush3.bf16.msra.mxu0 %v1432_v37  ;;  %v1438_v44 = vld [vmem:[%s1771_s18 + $0x18] sm:$0xff]   ;;  %vm844_vm11 = vcmask 64512   ;;  %v1584_v11 = vmov 0   ;;  %v843_v12 = vld [vmem:[#allocation4] sm:$0xff]  ;;  %vm866_vm12 = vcmask 7168  }
 0x25b   : > { %1282 = vmatpush3.bf16.msra.mxu1 %v1433_v38  ;;  %1271 = vmatprep.subr.bf16.mxu0 %v1582_v39  ;;  %v1439_v45 = vld [vmem:[%s1776_s25 + $0x18] sm:$0xff]   ;;  %v1209_v50 = vld [vmem:[%s1911_s2] ss:$0 sm:$0xff]  ;;  %p926_p10 = scmp.eq.s32.totalorder %s1544_s12, 1  ;;  %v860_v24 = vld [vmem:[#allocation5] sm:$0xff]  ;;  %p1223_p11 = scmp.ne.s32.totalorder %s1544_s12, 1 }
 0x25c   : > { %1283 = vmatprep.subr.bf16.mxu1 %v1582_v39  ;;  %1277 = vmatprep.mubr.msk.bf16.mxu0 %vm1583_vm8, %v1582_v39  ;;  %v1210_v52 = vld [vmem:[%s1912_s3] ss:$0 sm:$0xff]  ;;  %v868_v28 = vld [vmem:[#allocation6] sm:$0xff]  ;;  %v1585_v37 = vmov (!%p1223_p11), 0   ;;  %vm1587_vm13 = vmmov (!%p1223_p11), 0  }
 0x25d   : > { %1289 = vmatprep.mubr.msk.bf16.mxu1 %vm1583_vm8, %v1582_v39  ;;  %1430 = vset.pattern.permute.xlu1 %v1584_v11 }
 0x25e   : > { %1272 = vmatpush3.bf16.msra.mxu0 %v1434_v40  ;;  %v794_v4 = vld [vmem:[#allocation3] sm:$0xf]  ;;  %1431 = vset.pattern.permute.xlu0 %v1584_v11  ;;  %v1586_v40 = vmov (!%p1223_p11), 0.0  }
 0x25f   : > { %1284 = vmatpush3.bf16.msra.mxu1 %v1435_v41  ;;  %1273 = vmatprep.subr.bf16.mxu0 %v1582_v39 }
 0x260   : > { %1285 = vmatprep.subr.bf16.mxu1 %v1582_v39 }
 0x262   : > { %1274 = vmatpush3.bf16.msra.mxu0 %v1436_v42 }
 0x263   : > { %1286 = vmatpush3.bf16.msra.mxu1 %v1437_v43  ;;  %1275 = vmatprep.subr.bf16.mxu0 %v1582_v39 }
 0x264   : > { %1287 = vmatprep.subr.bf16.mxu1 %v1582_v39 }
 0x266   : > { %1276 = vmatpush3.bf16.msra.mxu0 %v1438_v44 }
 0x267   : > { %1288 = vmatpush3.bf16.msra.mxu1 %v1439_v45  ;;  %1293 = vmatprep.subr.bf16.mxu0 %v1582_v39  ;;  %v939_v45 = vld [vmem:[#allocation7] sm:$0xff] (!%p1223_p11) }
 0x268   : > { %1299 = vmatprep.subr.bf16.mxu1 %v1582_v39 }
 0x2e7   : > { %v618_v32 = vpop.xlane.xlu0 %617 }
 0x2e8   : > { %v620_v33 = vmul.f32 0.015625, %v618_v32 }
 0x2ea   : > { %v621_v34 = vsub.f32 %v612_v30, %v620_v33 }
 0x2ec   : > { %v622_v35 = vmul.f32 %v621_v34, %v621_v34 }
 0x2ee   : > { %v623_v36 = vsel %vm615_vm7, %v622_v35, 0.0 }
 0x2ef   : > { %624 = vadd.xlane.f32.xlu0 %v623_v36 }
 0x37c   : > { %v625_v46 = vpop.xlane.xlu0 %624 }
 0x37d   : > { %v626_v47 = vmul.f32 0.015625, %v625_v46 }
 0x37f   : > { %v627_v48 = vadd.f32 1e-05, %v626_v47 }
 0x381   : > { %1440 = vrsqrt.f32 %v627_v48 }
 0x38b   : > { %v1441_v49 = vpop.eup %1440 }
 0x38c   : > { %v629_v51 = vmul.f32 %v1441_v49, %v621_v34 }
 0x38e   : > { %v636_v53 = vmul.f32 %v1209_v50, %v629_v51 }
 0x390   : > { %v643_v54 = vadd.f32 %v1210_v52, %v636_v53 }
 0x392   : > { %v644_v55 = vpack.c.bf16 %v643_v54, %v643_v54 }
 0x394   : > { %1278 = vmatmul.mubr.msk.bf16.vlgmr.msra.gmra.mrb[0].mxu0 %vm615_vm7, %v644_v55  ;;  %1290 = vmatmul.mubr.msk.bf16.vlgmr.msra.gmra.mrb[0].mxu1 %vm615_vm7, %v644_v55 }
 0x395   : > { %1295 = vmatprep.mubr.msk.bf16.mxu0 %vm1583_vm8, %v1582_v39  ;;  %1301 = vmatprep.mubr.msk.bf16.mxu1 %vm1583_vm8, %v1582_v39  ;;  %v1447_v39 = vld [vmem:[%s1781_s20] sm:$0xff] (!%p1223_p11)  }
 0x467   : > { %v714_v56 = vpop.f32.mrb[0].mxu0  ;;  %v787_v57 = vpop.f32.mrb[0].mxu1 }
 0x468   : > { %v720_v58 = vpack.c.bf16 %v714_v56, %v714_v56  ;;  %v793_v59 = vpack.c.bf16 %v787_v57, %v787_v57  ;;  %v1279_v60 = vpop.f32.mrb[1].mxu0  ;;  %v1291_v61 = vpop.f32.mrb[1].mxu1 }
 0x469   : > { %v717_v62 = vpop.f32.mrb[2].mxu0  ;;  %v790_v63 = vpop.f32.mrb[2].mxu1 }
 0x46a   : > { %v800_v0 = vsel %vm795_vm9, %v720_v58, 0  ;;  %v881_v1 = vsel %vm879_vm10, %v793_v59, 0  ;;  %v1280_v2 = vpop.f32.mrb[3].mxu0  ;;  %v1292_v3 = vpop.f32.mrb[3].mxu1 }
 0x46b   : > { %1294 = vmatpush3.bf16.xpose.msra.mxu0 %v800_v0  ;;  %1300 = vmatpush3.bf16.msra.mxu1 %v881_v1 }
 0x46c   : > { %1305 = vmatprep.subr.bf16.mxu0 (!%p1223_p11), %v1586_v40 }
 0x472   : > { %1296 = vmatmul.mubr.msk.bf16.vlgmr.msra.gmra.mrb[4].mxu0 %vm795_vm9, %v794_v4 }
 0x473   : > { %1306 = vmatpush3.bf16.msra.mxu0 (!%p1223_p11), %v1447_v39  ;;  %1307 = vmatprep.mubr.msk.bf16.mxu0 (!%p1223_p11), %vm1587_vm13, %v1586_v40 }
 0x545   : > { %v836_v5 = vpop.f32.mrb[4].mxu0 }
 0x546   : > { %v842_v6 = vmul.f32 0.25, %v836_v5  ;;  %v1297_v7 = vpop.f32.mrb[5].mxu0 }
 0x547   : > { %v839_v8 = vpop.f32.mrb[6].mxu0 }
 0x548   : > { %v1298_v9 = vpop.f32.mrb[7].mxu0  ;;  %v845_v10 = vsel %vm844_vm11, %v842_v6, -inf }
 0x549   : > { %846 = vmax.xlane.f32.xlu1 %v845_v10 }
 0x5d6   : > { %v847_v13 = vpop.xlane.xlu1 %846 }
 0x5d7   : > { %v848_v14 = vmax.f32 %v843_v12, %v847_v13 }
 0x5d9   : > { %v849_v15 = vsub.f32 %v843_v12, %v848_v14  ;;  %925 = vst.msk [vmem:[#allocation4] sm:$0xff] %vm866_vm12, %v848_v14  ;;  %854 = vperm.xlu1 %1430, %v848_v14  }
 0x5db   : > { %v850_v22 = vmul.f32 1.442695, %v849_v15 }
 0x658   : > { %v855_v16 = vpop.permute.xlu1 %854 }
 0x659   : > { %v857_v17 = vsub.f32 %v842_v6, %v855_v16 }
 0x65b   : > { %v858_v18 = vmul.f32 1.442695, %v857_v17 }
 0x65d   : > { %1442 = vpow2.f32 %v858_v18 }
 0x65e   : > { %1444 = vpow2.f32 %v850_v22 }
 0x667   : > { %v1443_v19 = vpop.eup %1442 }
 0x668   : > { %v862_v20 = vsel %vm844_vm11, %v1443_v19, 0.0  ;;  %v875_v21 = vpack.c.bf16 %v1443_v19, %v1443_v19  ;;  %v1445_v23 = vpop.eup %1444 }
 0x669   : > { %863 = vadd.xlane.f32.xlu0 %v862_v20  ;;  %v861_v25 = vmul.f32 %v1445_v23, %v860_v24 }
 0x66a   : > { %1302 = vmatmul.mubr.msk.bf16.vlgmr.msra.gmra.mrb[4].mxu1 %vm844_vm11, %v875_v21 }
 0x67f   : > { %871 = vperm.xlu0 %1431, %v1445_v23  }
 0x683   : > { %1446 = vset.pattern.permute.xlu0 (!%p1223_p11), %v1585_v37 }
 0x6f6   : > { %v864_v26 = vpop.xlane.xlu0 %863 }
 0x6f7   : > { %v865_v27 = vadd.f32 %v864_v26, %v861_v25 }
 0x6f9   : > { %867 = vst.msk [vmem:[#allocation5] sm:$0xff] %vm866_vm12, %v865_v27 }
 0x6fe   : > { %v872_v29 = vpop.permute.xlu0 %871 }
 0x6ff   : > { %v874_v30 = vmul.f32 %v872_v29, %v868_v28 }
 0x700   : > { %v931_v36 = vld [vmem:[#allocation5] sm:$0xff] (!%p1223_p11) }
 0x701   : > { %1448 = vrcp.f32 (!%p1223_p11), %v931_v36 }
 0x70b   : > { %v1449_v38 = vpop.eup (!%p1223_p11), %1448 }
 0x70c   : > { %935 = vperm.xlu0 (!%p1223_p11), %1446, %v1449_v38  }
 0x73a   : > { %929 = sbr.rel (%p1223_p11) target bundleno = 2151 (0x867), region = 68 }
 0x73d   : > { %v917_v31 = vpop.f32.mrb[4].mxu1 }
 0x73e   : > { %v923_v32 = vadd.f32 %v917_v31, %v874_v30  ;;  %v1303_v33 = vpop.f32.mrb[5].mxu1 }
 0x73f   : > { %v920_v34 = vpop.f32.mrb[6].mxu1 }
 0x740   : > { %924 = vst.msk [vmem:[#allocation6] sm:$0xff] %vm795_vm9, %v923_v32  ;;  %v1304_v35 = vpop.f32.mrb[7].mxu1 }
 0x747   : > { %v930_v41 = vld [vmem:[#allocation6] sm:$0xff] }
 0x78b   : > { %v936_v42 = vpop.permute.xlu0 %935 }
 0x78c   : > { %v938_v43 = vmul.f32 %v936_v42, %v930_v41 }
 0x78e   : > { %v940_v44 = vpack.c.bf16 %v938_v43, %v938_v43 }
 0x790   : > { %1308 = vmatmul.mubr.msk.bf16.vlgmr.msra.gmra.mrb[0].mxu0 %vm795_vm9, %v940_v44 }
 0x863   : > { %v986_v46 = vpop.f32.mrb[0].mxu0 }
 0x864   : > { %v992_v47 = vadd.f32 %v986_v46, %v939_v45  ;;  %v1309_v48 = vpop.f32.mrb[1].mxu0 }
 0x865   : > { %v989_v49 = vpop.f32.mrb[2].mxu0 }
 0x866   : > { %993 = vst.msk [vmem:[#allocation7] sm:$0xff] %vm615_vm7, %v992_v47  ;;  %v1310_v50 = vpop.f32.mrb[3].mxu0 }
 0x867 PF: > { %p994_p12 = scmp.eq.s32.totalorder %s1548_s13, 3 }
 0x869   : > { %p995_p13 = pnand %p994_p12, %p926_p10 }
 0x86a   : > { %v1226_v52 = vld [vmem:[%s1917_s8] ss:$0 sm:$0xff] (!%p995_p13) }
 0x86b   : > { %998 = sbr.rel (%p995_p13) target bundleno = 2163 (0x873), region = 72  ;;  %v1008_v53 = vld [vmem:[%s1754_s16] sm:$0xff] (!%p995_p13) }
 0x86d   : > { %v999_v51 = vld [vmem:[#allocation7] sm:$0xff] (!%p995_p13) }
 0x86e   : > { %v1007_v54 = vadd.f32 (!%p995_p13), %v1226_v52, %v999_v51 }
 0x870   : > { %v1009_v55 = vadd.f32 (!%p995_p13), %v1008_v53, %v1007_v54 }
 0x872   : > { %1010 = vst.msk [vmem:[%s444_s28] sm:$0xff] %vm615_vm7, %v1009_v55 }
 0x873 PF: > { %s1955_s12 = sld [smem:[#allocation12_spill]]  ;;  %s1228_s19 = sshll.u32 %s1556_s15, 1 }
 0x874   : > { %s1023_s23 = sadd.s32 %s1552_s14, %s1228_s19  ;;  %s1027_s25 = sshll.u32 %s444_s28, 4  ;;  %s1846_s25 = int_to_ptr.vmem [resolvable:$true] %s1027_s25 }
 0x875   : > { %s1229_s22 = sshll.u32 %s1023_s23, 7  ;;  %s1957_s20 = sld [smem:[#allocation27_spill]] }
 0x876   : > { %s1450_s27 = scalar_lea.vmem %s1846_s25, 128  ;;  %s1588_s14 = smov [#allocation8]  }
 0x877   : > { %p1451_p0 = scmp.ne.s32.totalorder %s1846_s25, %s1450_s27  ;;  %s1454_s15 = sshll.u32 %s1588_s14, 4  ;;  %s1455_s15 = int_to_ptr.vmem [resolvable:$false] %s1454_s15 }
 0x878   : > { %s1456_s29 = scalar_lea.vmem %s1455_s15, 256  ;;  %p1457_p3 = scmp.lt.s32.totalorder %s1846_s25, %s1455_s15 }
 0x879   : > { %s1959_s10 = sand.u32 1, %s1955_s12   ;;  %p1452_p1 = pnand %p1451_p0, %p1712_p5 }
 0x87a   : > { %s1012_s11 = scalar_lea.sflag [#allocation9], %s1959_s10  ;;  %p1458_p4 = scmp.lt.s32.totalorder %s1456_s29, %s1450_s27 }
 0x87b   : > { %s1958_s0 = smov %s1957_s20  ;;  %s1025_s30 = scalar_lea.hbm %s1957_s20, %s1229_s22 }
 0x87c   : > { %p1453_p2 = pneg %p1452_p1  ;;  %p1459_p6 = por %p1458_p4, %p1457_p3 }
 0x87e   : > { %p1460_p8 = pnand %p1459_p6, %p1453_p2 }
 0x880   : > { %1463 = shalt.err (!%p1460_p8)
}
 0x881   : > { %s1464_s28 = scalar_lea.hbm %s1025_s30, 128  ;;  %s1468_s26 = scalar_lea.hbm %s1958_s0, 512 }
 0x882   : > { %p1465_p9 = scmp.ne.s32.totalorder %s1025_s30, %s1464_s28  ;;  %p1469_p12 = scmp.lt.u32.totalorder %s1025_s30, %s1958_s0 }
 0x883   : > { %p1470_p13 = scmp.lt.u32.totalorder %s1468_s26, %s1464_s28  ;;  %p1472_p1 = scmp.lt.u32.totalorder %s1464_s28, %s1025_s30 }
 0x884   : > { %p1466_p10 = pnand %p1465_p9, %p1712_p5 }
 0x885   : > { %p1471_p0 = por %p1470_p13, %p1469_p12 }
 0x886   : > { %p1467_p11 = pneg %p1466_p10 }
 0x887   : > { %p1473_p3 = por %p1472_p1, %p1471_p0 }
 0x889   : > { %p1474_p2 = pnand %p1473_p3, %p1467_p11 }
 0x88b   : > { %1477 = shalt.err (!%p1474_p2)
}
 0x88c   : > { %1311 = dma.vmem_to_hbm [thread:$0]  (%p1712_p5), %s1846_s25, 128, %s1025_s30, %s1012_s11  }
 0x88d PF: > { %s1960_s12 = sld [smem:[#allocation18_spill]]  ;;  %s1961_s19 = sld [smem:[#allocation11_spill]] }
 0x893   : > { %p1317_p4 = scmp.ge.s32.totalorder %s1960_s12, 2  ;;  %s1039_s22 = sand.u32 1, %s1961_s19  }
 0x894   : > { %s1040_s9 = scalar_lea.sflag [#allocation9], %s1039_s22 }
 0x895   : > { %p1314_p6 = pnand %p1317_p4, %p1719_p7 }
 0x897   : > { %1527 = dma.done.wait (!%p1314_p6), %s1040_s9, 128  }
 0x898   : > { %1529 = vsyncadd (!%p1314_p6), %s1040_s9, 4294967168  ;;  %s22_s20 = sadd.s32 1, %s1960_s12   ;;  %s1963_s30 = sld [smem:[#allocation12_spill]] }
 0x899   : > { %p19_p8 = scmp.ge.s32.totalorder %s22_s20, 34   ;;  %s1964_s10 = sld [smem:[#allocation13_spill]] }
 0x89a   : > { %s1965_s11 = sld [smem:[#allocation25_spill]]  ;;  %s1967_s13 = sld [smem:[#allocation15_spill]] }
 0x89b   : > { %s1966_s12 = sld [smem:[#allocation14_spill]]  ;;  %s1968_s14 = sld [smem:[#allocation16_spill]] }
 0x89c   : > { %s1969_s15 = sld [smem:[#allocation17_spill]]  ;;  %s1970_s16 = sld [smem:[#allocation19_spill]] }
 0x89d   : > { %s1971_s17 = sld [smem:[#allocation21_spill]]  ;;  %s1972_s18 = sld [smem:[#allocation23_spill]] }
 0x89e   : > { %s1973_s19 = sld [smem:[#allocation24_spill]]  ;;  %21 = sbr.rel (!%p19_p8) target bundleno = 10 (0xa), region = 122 }
 0x8a5   :  { %1045 = vsyncpa [#allocation9], 1 }
 0x8a6   :  { %1047 = vsyncpa [#allocation9 + $0x1], 1 }

</bundles_post_ra>
